<compile_context>
chip_gen: v7x
topology: tpu7x:2x2x1
jax: 0.10.0
libtpu: 0.0.40
codegen_flags: <defaults>
</compile_context>

<pallas_src>
import jax
import jax.numpy as jnp
from jax.experimental import pallas as pl
from jax.experimental.pallas import tpu as pltpu


def _round_up(x, m):
    return (x + m - 1) // m * m


def _dis_kernel(z_ref,
                w1_ref, b1_ref,
                w2_ref, b2_ref,
                w3_ref, b3_ref,
                w4_ref, b4_ref,
                out_ref):
    f32 = jnp.float32
    bf16 = jnp.bfloat16

    # z tile arrives as f32; cast to bf16 on the VPU (hidden under DMA/MXU).
    z = z_ref[...].astype(bf16)

    # Layer 1: (TM, 240) @ (240, 128) -> f32 accumulation (Mosaic masks K=240).
    h = jnp.dot(z, w1_ref[...], preferred_element_type=f32)
    h = jnp.maximum(h + b1_ref[...], 0.0)
    # Layer 2: (TM, 128) @ (128, 128)
    h = jnp.dot(h.astype(bf16), w2_ref[...], preferred_element_type=f32)
    h = jnp.maximum(h + b2_ref[...], 0.0)
    # Layer 3: (TM, 128) @ (128, 128)
    h = jnp.dot(h.astype(bf16), w3_ref[...], preferred_element_type=f32)
    h = jnp.maximum(h + b3_ref[...], 0.0)
    # Layer 4: Linear(L -> 1) as a per-row dot product with the single logit
    # row (VPU multiply + XLU lane reduction).  Keeps the MXU at exactly three
    # layers and avoids transposing the (TM, 128) activation tile.  Padded
    # hidden lanes are exactly zero (zero-padded weights/biases + ReLU), so
    # they contribute nothing.
    logits = jnp.sum(h * w4_ref[...], axis=-1, keepdims=True) + b4_ref[...]
    out_ref[...] = jax.nn.sigmoid(logits)


def preprocess_params(params):
    """One-time pad (120 -> 128) + bf16 cast of the weights.

    params: dict with w1..w4 stored transposed, i.e. (in_features, out_features),
            and b1..b4 of shape (1, out_features), all f32.
    Returns a dict of kernel-ready arrays (reuse across forward calls).
    """
    latent = params["w1"].shape[1]
    lp = _round_up(latent, 128)          # 120 -> 128
    pad = lp - latent
    bf16, f32 = jnp.bfloat16, jnp.float32

    out = {
        # Matmul weights in bf16 (f32 accumulation in the kernel).
        "w1": jnp.pad(params["w1"].astype(bf16), ((0, 0), (0, pad))),
        "w2": jnp.pad(params["w2"].astype(bf16), ((0, pad), (0, pad))),
        "w3": jnp.pad(params["w3"].astype(bf16), ((0, pad), (0, pad))),
        # Final layer is a per-row dot product done in f32 on the VPU/XLU.
        "w4": jnp.pad(params["w4"].astype(f32).T, ((0, 0), (0, pad))),
        # NOTE: b1..b3 MUST be zero-padded so padded hidden lanes stay exactly
        # zero through bias+ReLU (layers 2/3/4 rely on this).
        "b1": jnp.pad(params["b1"].astype(f32), ((0, 0), (0, pad))),
        "b2": jnp.pad(params["b2"].astype(f32), ((0, 0), (0, pad))),
        "b3": jnp.pad(params["b3"].astype(f32), ((0, 0), (0, pad))),
        "b4": params["b4"].astype(f32).reshape(1, 1),
    }
    return out


def _choose_tm(n, block_rows):
    """Batch tile: big enough to amortize per-step overhead, multiple of 8."""
    block_rows = max(8, _round_up(block_rows, 8))
    tm = min(block_rows, _round_up(n, 8))
    # If the whole batch would be a single big tile, split it in two so both
    # v7x TensorCores get work (only when each half stays large).
    if tm > 1024 and pl.cdiv(n, tm) == 1:
        tm = _round_up(pl.cdiv(n, 2), 8)
    return tm


def dis_forward(z, prepped, *, block_rows=2048):
    """Dis discriminator forward pass as a single fused Pallas kernel.

    z:       (N, 2 * latent_dim) float32 (passed through unpadded).
    prepped: output of preprocess_params(params).
    Returns: (N, 1) float32 in [0, 1].
    """
    n, in_dim = z.shape
    w1 = prepped["w1"]
    assert w1.shape[0] == in_dim, (w1.shape, in_dim)
    lp = w1.shape[1]

    tm = _choose_tm(n, block_rows)
    grid = (pl.cdiv(n, tm),)

    in_specs = [
        # z: streamed / double-buffered per batch tile; last dim is the full
        # 2L extent (legal: full array dim), cast to bf16 inside the kernel.
        pl.BlockSpec((tm, in_dim), lambda i: (i, 0)),
        pl.BlockSpec((in_dim, lp), lambda i: (0, 0)),   # w1 (VMEM-resident)
        pl.BlockSpec((1, lp),      lambda i: (0, 0)),   # b1
        pl.BlockSpec((lp, lp),     lambda i: (0, 0)),   # w2
        pl.BlockSpec((1, lp),      lambda i: (0, 0)),   # b2
        pl.BlockSpec((lp, lp),     lambda i: (0, 0)),   # w3
        pl.BlockSpec((1, lp),      lambda i: (0, 0)),   # b3
        pl.BlockSpec((1, lp),      lambda i: (0, 0)),   # w4 (logit row, f32)
        pl.BlockSpec((1, 1),       lambda i: (0, 0)),   # b4
    ]
    out_specs = pl.BlockSpec((tm, 1), lambda i: (i, 0))

    flops = 2 * n * (in_dim * lp + 2 * lp * lp + lp)
    weight_bytes = 2 * (in_dim * lp + 2 * lp * lp) + 4 * (4 * lp + 1)
    bytes_accessed = 4 * n * in_dim + weight_bytes + 4 * n
    cost = pl.CostEstimate(flops=flops, transcendentals=n,
                           bytes_accessed=bytes_accessed)

    out = pl.pallas_call(
        _dis_kernel,
        out_shape=jax.ShapeDtypeStruct((n, 1), jnp.float32),
        grid=grid,
        in_specs=in_specs,
        out_specs=out_specs,
        compiler_params=pltpu.CompilerParams(
            dimension_semantics=("parallel",)),
        cost_estimate=cost,
    )(z.astype(jnp.float32),
      prepped["w1"], prepped["b1"],
      prepped["w2"], prepped["b2"],
      prepped["w3"], prepped["b3"],
      prepped["w4"], prepped["b4"])
    return out


def init_params(key, latent_dim=120):
    """Deterministic synthetic parameters matching the PyTorch module
    (stored transposed: (in_features, out_features)), f32."""
    dims = [(2 * latent_dim, latent_dim),
            (latent_dim, latent_dim),
            (latent_dim, latent_dim),
            (latent_dim, 1)]
    params = {}
    keys = jax.random.split(key, 2 * len(dims))
    for i, (fan_in, fan_out) in enumerate(dims):
        bound = 1.0 / jnp.sqrt(fan_in)
        w = jax.random.uniform(keys[2 * i], (fan_in, fan_out),
                               minval=-bound, maxval=bound, dtype=jnp.float32)
        b = jax.random.uniform(keys[2 * i + 1], (1, fan_out),
                               minval=-bound, maxval=bound, dtype=jnp.float32)
        params[f"w{i + 1}"] = w
        params[f"b{i + 1}"] = b
    return params


def dis_reference(z, params):
    """Pure-JAX f32 reference for correctness checking."""
    h = jnp.maximum(z @ params["w1"] + params["b1"], 0.0)
    h = jnp.maximum(h @ params["w2"] + params["b2"], 0.0)
    h = jnp.maximum(h @ params["w3"] + params["b3"], 0.0)
    return jax.nn.sigmoid(h @ params["w4"] + params["b4"])


if __name__ == "__main__":
    latent_dim = 120

    key = jax.random.PRNGKey(0)
    k_params, k_z1, k_z2 = jax.random.split(key, 3)
    params = init_params(k_params, latent_dim)
    prepped = preprocess_params(params)          # hoisted: done once, reused

    fwd = jax.jit(dis_forward)

    # Small-batch check (matches the module's typical usage shape).
    z_small = jax.random.normal(k_z1, (8, 2 * latent_dim), dtype=jnp.float32)
    out_small = jax.block_until_ready(fwd(z_small, prepped))
    ref_small = dis_reference(z_small, params)
    assert out_small.shape == (8, 1), out_small.shape
    assert jnp.allclose(out_small, ref_small, atol=3e-2, rtol=3e-2), (
        "small-batch mismatch", float(jnp.max(jnp.abs(out_small - ref_small))))

    # Larger batch: exercises the multi-step grid (TM=2048) with a ragged
    # last tile and the megacore-parallel batch axis.
    z_big = jax.random.normal(k_z2, (2304, 2 * latent_dim), dtype=jnp.float32)
    out_big = jax.block_until_ready(fwd(z_big, prepped))
    ref_big = dis_reference(z_big, params)
    assert out_big.shape == (2304, 1), out_big.shape
    # bf16 MXU inputs (f32 accumulation) -> relaxed tolerance vs f32 reference.
    assert jnp.allclose(out_big, ref_big, atol=5e-2, rtol=5e-2), (
        "large-batch mismatch", float(jnp.max(jnp.abs(out_big - ref_big))))

    print("KERNEL_OK")
</pallas_src>

<mosaic_0001>
module attributes {stable_mosaic.version = 11 : i64} {
  func.func @_dis_kernel(%arg0: i32, %arg1: memref<8x240xf32, #tpu.memory_space<vmem>>, %arg2: memref<240x128xbf16, #tpu.memory_space<vmem>>, %arg3: memref<1x128xf32, #tpu.memory_space<vmem>>, %arg4: memref<128x128xbf16, #tpu.memory_space<vmem>>, %arg5: memref<1x128xf32, #tpu.memory_space<vmem>>, %arg6: memref<128x128xbf16, #tpu.memory_space<vmem>>, %arg7: memref<1x128xf32, #tpu.memory_space<vmem>>, %arg8: memref<1x128xf32, #tpu.memory_space<vmem>>, %arg9: memref<1x1xf32, #tpu.memory_space<vmem>>, %arg10: memref<8x1xf32, #tpu.memory_space<vmem>>) attributes {dimension_semantics = [#tpu.dimension_semantics<parallel>], iteration_bounds = array<i64: 1>, scalar_prefetch = 0 : i64, scratch_operands = 0 : i64, tpu.core_type = #tpu.core_type<tc>, window_params = [{transform_indices = @transform_0, window_bounds = array<i64: 8, 240>}, {pipeline_mode = #tpu.pipeline_mode<synchronous>, transform_indices = @transform_1, window_bounds = array<i64: 240, 128>}, {pipeline_mode = #tpu.pipeline_mode<synchronous>, transform_indices = @transform_2, window_bounds = array<i64: 1, 128>}, {pipeline_mode = #tpu.pipeline_mode<synchronous>, transform_indices = @transform_3, window_bounds = array<i64: 128, 128>}, {pipeline_mode = #tpu.pipeline_mode<synchronous>, transform_indices = @transform_4, window_bounds = array<i64: 1, 128>}, {pipeline_mode = #tpu.pipeline_mode<synchronous>, transform_indices = @transform_5, window_bounds = array<i64: 128, 128>}, {pipeline_mode = #tpu.pipeline_mode<synchronous>, transform_indices = @transform_6, window_bounds = array<i64: 1, 128>}, {pipeline_mode = #tpu.pipeline_mode<synchronous>, transform_indices = @transform_7, window_bounds = array<i64: 1, 128>}, {pipeline_mode = #tpu.pipeline_mode<synchronous>, transform_indices = @transform_8, window_bounds = array<i64: 1, 1>}, {transform_indices = @transform_9, window_bounds = array<i64: 8, 1>}]} {
    %c0 = arith.constant 0 : index
    %c0_0 = arith.constant 0 : index
    %0 = vector.load %arg1[%c0, %c0_0] : memref<8x240xf32, #tpu.memory_space<vmem>>, vector<8x240xf32>
    %1 = arith.truncf %0 : vector<8x240xf32> to vector<8x240xbf16>
    %c0_1 = arith.constant 0 : index
    %c0_2 = arith.constant 0 : index
    %2 = vector.load %arg2[%c0_1, %c0_2] : memref<240x128xbf16, #tpu.memory_space<vmem>>, vector<240x128xbf16>
    %cst = arith.constant dense<0.000000e+00> : vector<8x128xf32>
    %3 = tpu.matmul %1, %2, %cst {dimension_numbers = #tpu.dot_dimension_numbers<[1], [0], [0], [1], [0, 0, 1, 1], [], []>} : vector<8x240xbf16>, vector<240x128xbf16>, vector<8x128xf32> -> vector<8x128xf32>
    %c0_3 = arith.constant 0 : index
    %c0_4 = arith.constant 0 : index
    %4 = vector.load %arg3[%c0_3, %c0_4] : memref<1x128xf32, #tpu.memory_space<vmem>>, vector<1x128xf32>
    %5 = vector.broadcast %4 : vector<1x128xf32> to vector<8x128xf32>
    %6 = arith.addf %3, %5 : vector<8x128xf32>
    %cst_5 = arith.constant 0.000000e+00 : f32
    %7 = vector.broadcast %cst_5 : f32 to vector<8x128xf32>
    %8 = arith.maximumf %6, %7 : vector<8x128xf32>
    %9 = arith.truncf %8 : vector<8x128xf32> to vector<8x128xbf16>
    %c0_6 = arith.constant 0 : index
    %c0_7 = arith.constant 0 : index
    %10 = vector.load %arg4[%c0_6, %c0_7] : memref<128x128xbf16, #tpu.memory_space<vmem>>, vector<128x128xbf16>
    %cst_8 = arith.constant dense<0.000000e+00> : vector<8x128xf32>
    %11 = tpu.matmul %9, %10, %cst_8 {dimension_numbers = #tpu.dot_dimension_numbers<[1], [0], [0], [1], [0, 0, 1, 1], [], []>} : vector<8x128xbf16>, vector<128x128xbf16>, vector<8x128xf32> -> vector<8x128xf32>
    %c0_9 = arith.constant 0 : index
    %c0_10 = arith.constant 0 : index
    %12 = vector.load %arg5[%c0_9, %c0_10] : memref<1x128xf32, #tpu.memory_space<vmem>>, vector<1x128xf32>
    %13 = vector.broadcast %12 : vector<1x128xf32> to vector<8x128xf32>
    %14 = arith.addf %11, %13 : vector<8x128xf32>
    %cst_11 = arith.constant 0.000000e+00 : f32
    %15 = vector.broadcast %cst_11 : f32 to vector<8x128xf32>
    %16 = arith.maximumf %14, %15 : vector<8x128xf32>
    %17 = arith.truncf %16 : vector<8x128xf32> to vector<8x128xbf16>
    %c0_12 = arith.constant 0 : index
    %c0_13 = arith.constant 0 : index
    %18 = vector.load %arg6[%c0_12, %c0_13] : memref<128x128xbf16, #tpu.memory_space<vmem>>, vector<128x128xbf16>
    %cst_14 = arith.constant dense<0.000000e+00> : vector<8x128xf32>
    %19 = tpu.matmul %17, %18, %cst_14 {dimension_numbers = #tpu.dot_dimension_numbers<[1], [0], [0], [1], [0, 0, 1, 1], [], []>} : vector<8x128xbf16>, vector<128x128xbf16>, vector<8x128xf32> -> vector<8x128xf32>
    %c0_15 = arith.constant 0 : index
    %c0_16 = arith.constant 0 : index
    %20 = vector.load %arg7[%c0_15, %c0_16] : memref<1x128xf32, #tpu.memory_space<vmem>>, vector<1x128xf32>
    %21 = vector.broadcast %20 : vector<1x128xf32> to vector<8x128xf32>
    %22 = arith.addf %19, %21 : vector<8x128xf32>
    %cst_17 = arith.constant 0.000000e+00 : f32
    %23 = vector.broadcast %cst_17 : f32 to vector<8x128xf32>
    %24 = arith.maximumf %22, %23 : vector<8x128xf32>
    %c0_18 = arith.constant 0 : index
    %c0_19 = arith.constant 0 : index
    %25 = vector.load %arg8[%c0_18, %c0_19] : memref<1x128xf32, #tpu.memory_space<vmem>>, vector<1x128xf32>
    %26 = vector.broadcast %25 : vector<1x128xf32> to vector<8x128xf32>
    %27 = arith.mulf %24, %26 : vector<8x128xf32>
    %cst_20 = arith.constant dense<0.000000e+00> : vector<8xf32>
    %28 = vector.multi_reduction <add>, %27, %cst_20 [1] : vector<8x128xf32> to vector<8xf32>
    %29 = vector.shape_cast %28 : vector<8xf32> to vector<8x1xf32>
    %c0_21 = arith.constant 0 : index
    %c0_22 = arith.constant 0 : index
    %30 = vector.load %arg9[%c0_21, %c0_22] : memref<1x1xf32, #tpu.memory_space<vmem>>, vector<1x1xf32>
    %31 = vector.broadcast %30 : vector<1x1xf32> to vector<8x1xf32>
    %32 = arith.addf %29, %31 : vector<8x1xf32>
    %33 = arith.negf %32 : vector<8x1xf32>
    %34 = math.exp %33 : vector<8x1xf32>
    %cst_23 = arith.constant 1.000000e+00 : f32
    %35 = vector.broadcast %cst_23 : f32 to vector<8x1xf32>
    %36 = arith.addf %35, %34 : vector<8x1xf32>
    %37 = arith.divf %35, %36 : vector<8x1xf32>
    %c0_24 = arith.constant 0 : index
    %c0_25 = arith.constant 0 : index
    %38 = vector.load %arg10[%c0_24, %c0_25] : memref<8x1xf32, #tpu.memory_space<vmem>>, vector<8x1xf32>
    tpu.vector_store %arg10[%c0_24, %c0_25], %37 {strides = array<i32>} : memref<8x1xf32, #tpu.memory_space<vmem>>, vector<8x1xf32>,
    return
  }
  func.func @transform_0(%arg0: i32) -> (i32, i32) {
    %c0_i32 = arith.constant 0 : i32
    %c0_i32_0 = arith.constant 0 : i32
    return %arg0, %c0_i32 : i32, i32
  }
  func.func @transform_1(%arg0: i32) -> (i32, i32) {
    %c0_i32 = arith.constant 0 : i32
    %c0_i32_0 = arith.constant 0 : i32
    %c0_i32_1 = arith.constant 0 : i32
    return %c0_i32, %c0_i32_0 : i32, i32
  }
  func.func @transform_2(%arg0: i32) -> (i32, i32) {
    %c0_i32 = arith.constant 0 : i32
    %c0_i32_0 = arith.constant 0 : i32
    %c0_i32_1 = arith.constant 0 : i32
    return %c0_i32, %c0_i32_0 : i32, i32
  }
  func.func @transform_3(%arg0: i32) -> (i32, i32) {
    %c0_i32 = arith.constant 0 : i32
    %c0_i32_0 = arith.constant 0 : i32
    %c0_i32_1 = arith.constant 0 : i32
    return %c0_i32, %c0_i32_0 : i32, i32
  }
  func.func @transform_4(%arg0: i32) -> (i32, i32) {
    %c0_i32 = arith.constant 0 : i32
    %c0_i32_0 = arith.constant 0 : i32
    %c0_i32_1 = arith.constant 0 : i32
    return %c0_i32, %c0_i32_0 : i32, i32
  }
  func.func @transform_5(%arg0: i32) -> (i32, i32) {
    %c0_i32 = arith.constant 0 : i32
    %c0_i32_0 = arith.constant 0 : i32
    %c0_i32_1 = arith.constant 0 : i32
    return %c0_i32, %c0_i32_0 : i32, i32
  }
  func.func @transform_6(%arg0: i32) -> (i32, i32) {
    %c0_i32 = arith.constant 0 : i32
    %c0_i32_0 = arith.constant 0 : i32
    %c0_i32_1 = arith.constant 0 : i32
    return %c0_i32, %c0_i32_0 : i32, i32
  }
  func.func @transform_7(%arg0: i32) -> (i32, i32) {
    %c0_i32 = arith.constant 0 : i32
    %c0_i32_0 = arith.constant 0 : i32
    %c0_i32_1 = arith.constant 0 : i32
    return %c0_i32, %c0_i32_0 : i32, i32
  }
  func.func @transform_8(%arg0: i32) -> (i32, i32) {
    %c0_i32 = arith.constant 0 : i32
    %c0_i32_0 = arith.constant 0 : i32
    %c0_i32_1 = arith.constant 0 : i32
    return %c0_i32, %c0_i32_0 : i32, i32
  }
  func.func @transform_9(%arg0: i32) -> (i32, i32) {
    %c0_i32 = arith.constant 0 : i32
    %c0_i32_0 = arith.constant 0 : i32
    return %arg0, %c0_i32 : i32, i32
  }
}

</mosaic_0001>

<bundles_post_ra>
// kernel: dis_forward.1
= control target key start
LH: loop header
LB: loop body
LE: loop exit
PB: predicated region body
PF: predicated region fallthrough
CT: control target
= control target key end

     0   :  { %s924_s0 = inlined_call_operand.hbm [shape: f32[8,240], index: 0, kind: input, shape index: {}]   ;;  %s925_s1 = inlined_call_operand.hbm [shape: bf16[240,128], index: 1, kind: input, shape index: {}]   ;;  %s926_s2 = inlined_call_operand.vmem [shape: f32[1,128], index: 2, kind: input, shape index: {}]   ;;  %s927_s3 = inlined_call_operand.hbm [shape: bf16[128,128], index: 3, kind: input, shape index: {}]   ;;  %s928_s4 = inlined_call_operand.vmem [shape: f32[1,128], index: 4, kind: input, shape index: {}]   ;;  %s929_s5 = inlined_call_operand.hbm [shape: bf16[128,128], index: 5, kind: input, shape index: {}]   ;;  %s930_s6 = inlined_call_operand.vmem [shape: f32[1,128], index: 6, kind: input, shape index: {}]   ;;  %s931_s7 = inlined_call_operand.vmem [shape: f32[1,128], index: 7, kind: input, shape index: {}]   ;;  %s932_s8 = inlined_call_operand.<no memory space> [shape: f32[1,1], index: 8, kind: input, shape index: {}]   ;;  %s933_s9 = inlined_call_operand.vmem [shape: f32[8,1], index: 9, kind: output, shape index: {}]  }
   0x1   :  { %v14_v0 = vstv %s932_s8 }
   0x2   :  { %15 = vst [vmem:[#allocation2] sm:$0x1] %v14_v0 }
   0x3   :  { %16 = vsyncpa [#allocation4], 0 }
   0x4   :  { %17 = vsyncpa [#allocation6], 0 }
   0x5   :  { %18 = vsyncpa [#allocation9], 0  ;;  %s757_s11 = smov [#allocation5]   ;;  %s663_s15 = scalar_lea.hbm %s925_s1, 1920 }
   0x6   :  { %s34_s12 = sshll.u32 %s757_s11, 4  ;;  %p664_p0 = scmp.ne.s32.totalorder %s925_s1, %s663_s15  ;;  %s35_s12 = int_to_ptr.vmem [resolvable:$true] %s34_s12 }
   0x7   :  { %p667_p1 = scmp.lt.u32.totalorder %s663_s15, %s925_s1 }
   0x9   :  { %p669_p2 = pnand %p667_p1, %p664_p0 }
   0xb   :  { %672 = shalt.err (!%p669_p2)
}
   0xc   :  { %s673_s8 = scalar_lea.vmem %s35_s12, 1920  ;;  %p678_p4 = scmp.lt.s32.totalorder %s35_s12, %s35_s12 }
   0xd   :  { %p674_p3 = scmp.ne.s32.totalorder %s35_s12, %s673_s8  ;;  %p679_p5 = scmp.lt.s32.totalorder %s673_s8, %s673_s8 }
   0xf   :  { %p680_p6 = por %p679_p5, %p678_p4 }
  0x11   :  { %p681_p7 = pnand %p680_p6, %p674_p3 }
  0x13   :  { %684 = shalt.err (!%p681_p7)
}
  0x14   :  { %s758_s20 = smov 64   ;;  %s759_s21 = smov 4  }
  0x15   :  { %40 = dma.hbm_to_vmem [thread:$0]  %s925_s1, 1920, %s35_s12, [#allocation6], %s758_s20, %s758_s20, %s759_s21  }
  0x16   :  { %s760_s24 = smov [#allocation3]   ;;  %s761_s26 = smov [#allocation7]  }
  0x17   :  { %s25_s25 = sshll.u32 %s760_s24, 4  ;;  %s48_s27 = sshll.u32 %s761_s26, 4  ;;  %s26_s25 = int_to_ptr.vmem [resolvable:$true] %s25_s25  ;;  %s49_s27 = int_to_ptr.vmem [resolvable:$true] %s48_s27 }
  0x18   :  { %s685_s30 = scalar_lea.hbm %s924_s0, 256 }
  0x19   :  { %p686_p8 = scmp.ne.s32.totalorder %s924_s0, %s685_s30  ;;  %p689_p9 = scmp.lt.u32.totalorder %s685_s30, %s924_s0 }
  0x1b   :  { %p691_p10 = pnand %p689_p9, %p686_p8 }
  0x1d   :  { %694 = shalt.err (!%p691_p10)
}
  0x1e   :  { %s695_s1 = scalar_lea.vmem %s26_s25, 256  ;;  %p700_p12 = scmp.lt.s32.totalorder %s26_s25, %s26_s25 }
  0x1f   :  { %p696_p11 = scmp.ne.s32.totalorder %s26_s25, %s695_s1  ;;  %p701_p13 = scmp.lt.s32.totalorder %s695_s1, %s695_s1 }
  0x21   :  { %p702_p0 = por %p701_p13, %p700_p12 }
  0x23   :  { %p703_p1 = pnand %p702_p0, %p696_p11 }
  0x25   :  { %706 = shalt.err (!%p703_p1)
}
  0x26   :  { %28 = dma.hbm_to_vmem [thread:$0]  %s924_s0, 256, %s26_s25, [#allocation4]  }
  0x27   :  { %s707_s18 = scalar_lea.hbm %s927_s3, 1024 }
  0x28   :  { %p708_p2 = scmp.ne.s32.totalorder %s927_s3, %s707_s18  ;;  %p711_p3 = scmp.lt.u32.totalorder %s707_s18, %s927_s3 }
  0x2a   :  { %p713_p4 = pnand %p711_p3, %p708_p2 }
  0x2c   :  { %716 = shalt.err (!%p713_p4)
}
  0x2d   :  { %s717_s24 = scalar_lea.vmem %s49_s27, 1024  ;;  %p722_p6 = scmp.lt.s32.totalorder %s49_s27, %s49_s27 }
  0x2e   :  { %p718_p5 = scmp.ne.s32.totalorder %s49_s27, %s717_s24  ;;  %p723_p7 = scmp.lt.s32.totalorder %s717_s24, %s717_s24 }
  0x30   :  { %p724_p8 = por %p723_p7, %p722_p6 }
  0x32   :  { %p725_p9 = pnand %p724_p8, %p718_p5 }
  0x34   :  { %728 = shalt.err (!%p725_p9)
}
  0x35   :  { %54 = dma.hbm_to_vmem [thread:$0]  %s927_s3, 1024, %s49_s27, [#allocation6], %s758_s20, %s758_s20, %s759_s21  }
  0x36   :  { %s762_s26 = smov [#allocation8]   ;;  %s729_s10 = scalar_lea.hbm %s929_s5, 1024 }
  0x37   :  { %s62_s28 = sshll.u32 %s762_s26, 4  ;;  %p730_p10 = scmp.ne.s32.totalorder %s929_s5, %s729_s10  ;;  %s63_s28 = int_to_ptr.vmem [resolvable:$true] %s62_s28 }
  0x38   :  { %p733_p11 = scmp.lt.u32.totalorder %s729_s10, %s929_s5 }
  0x3a   :  { %p735_p12 = pnand %p733_p11, %p730_p10 }
  0x3c   :  { %738 = shalt.err (!%p735_p12)
}
  0x3d   :  { %s739_s12 = scalar_lea.vmem %s63_s28, 1024  ;;  %p744_p0 = scmp.lt.s32.totalorder %s63_s28, %s63_s28 }
  0x3e   :  { %p740_p13 = scmp.ne.s32.totalorder %s63_s28, %s739_s12  ;;  %p745_p1 = scmp.lt.s32.totalorder %s739_s12, %s739_s12 }
  0x40   :  { %p746_p2 = por %p745_p1, %p744_p0 }
  0x42   :  { %p747_p3 = pnand %p746_p2, %p740_p13 }
  0x44   :  { %750 = shalt.err (!%p747_p3)
}
  0x45   :  { %68 = dma.hbm_to_vmem [thread:$0]  %s929_s5, 1024, %s63_s28, [#allocation9], %s758_s20, %s758_s20, %s759_s21  }
  0x46   :  { %751 = dma.done.wait [#allocation4], 256  }
  0x47   :  { %752 = vsyncadd [#allocation4], 4294967040 }
  0x48   :  { %753 = dma.done.wait [#allocation6], 2944  }
  0x49   :  { %754 = vsyncadd [#allocation6], 4294964352 }
  0x4a   :  { %755 = dma.done.wait [#allocation9], 1024  }
  0x4b   :  { %756 = vsyncadd [#allocation9], 4294966272  ;;  %v763_v1 = vmov 0   ;;  %v764_v2 = vmov 0.0   ;;  %v628_v3 = vld [vmem:[#allocation5] sm:$0xff]   ;;  %v629_v4 = vld [vmem:[#allocation5 + $0x8] sm:$0xff]  }
  0x4c   :  { %223 = vmatprep.subr.bf16.mxu0 %v763_v1  ;;  %579 = vmatprep.subr.bf16.mxu1 %v764_v2  ;;  %v630_v5 = vld [vmem:[#allocation5 + $0x10] sm:$0xff]   ;;  %v631_v6 = vld [vmem:[#allocation5 + $0x18] sm:$0xff]   ;;  %v632_v7 = vld [vmem:[#allocation5 + $0x20] sm:$0xff]   ;;  %vm219_vm0 = vcmask 916480   ;;  %vm765_vm1 = vmmov 0   ;;  %vm514_vm2 = vcmask 7168  }
  0x4d   :  { %224 = vmatpush1.bf16.msra.mxu0 %v628_v3  ;;  %v89_v8 = vld [vmem:[#allocation3 + $0x8] sm:$0xff]  ;;  %v633_v11 = vld [vmem:[#allocation5 + $0x28] sm:$0xff]   ;;  %v644_v12 = vld [vmem:[#allocation7 + $0x8] sm:$0xff]   ;;  %595 = vmatprep.mubr.msk.bf16.mxu1 %vm765_vm1, %v764_v2 }
  0x4e   :  { %225 = vmatprep.subr.bf16.mxu0 %v763_v1  ;;  %v91_v9 = vpack.c.bf16 %v89_v8, %v89_v8  ;;  %v643_v10 = vld [vmem:[#allocation7] sm:$0xff]   ;;  %v634_v13 = vld [vmem:[#allocation5 + $0x30] sm:$0xff]   ;;  %v645_v14 = vld [vmem:[#allocation7 + $0x10] sm:$0xff]  }
  0x4f   :  { %580 = vmatpush3.bf16.msra.mxu1 %v643_v10  ;;  %v635_v15 = vld [vmem:[#allocation5 + $0x38] sm:$0xff]   ;;  %v646_v16 = vld [vmem:[#allocation7 + $0x18] sm:$0xff]   ;;  %v636_v17 = vld [vmem:[#allocation5 + $0x40] sm:$0xff]  }
  0x50   :  { %539 = vmatprep.mubr.msk.bf16.mxu0 %vm219_vm0, %v91_v9  ;;  %581 = vmatprep.subr.bf16.mxu1 %v764_v2  ;;  %v647_v18 = vld [vmem:[#allocation7 + $0x20] sm:$0xff]   ;;  %v637_v19 = vld [vmem:[#allocation5 + $0x48] sm:$0xff]   ;;  %v648_v20 = vld [vmem:[#allocation7 + $0x28] sm:$0xff]  }
  0x51   :  { %226 = vmatpush1.bf16.msra.mxu0 %v629_v4  ;;  %v638_v21 = vld [vmem:[#allocation5 + $0x50] sm:$0xff]   ;;  %v639_v22 = vld [vmem:[#allocation5 + $0x58] sm:$0xff]   ;;  %v640_v23 = vld [vmem:[#allocation5 + $0x60] sm:$0xff]  }
  0x52   :  { %227 = vmatprep.subr.bf16.mxu0 %v763_v1  ;;  %v641_v24 = vld [vmem:[#allocation5 + $0x68] sm:$0xff]   ;;  %v642_v25 = vld [vmem:[#allocation5 + $0x70] sm:$0xff]   ;;  %v651_v37 = vld [vmem:[#allocation8] sm:$0xff]  }
  0x53   :  { %582 = vmatpush3.bf16.msra.mxu1 %v644_v12  ;;  %v88_v26 = vld [vmem:[#allocation3] sm:$0xff]  ;;  %v649_v28 = vld [vmem:[#allocation7 + $0x30] sm:$0xff]   ;;  %v652_v39 = vld [vmem:[#allocation8 + $0x8] sm:$0xff]  }
  0x54   :  { %583 = vmatprep.subr.bf16.mxu1 %v764_v2  ;;  %v90_v27 = vpack.c.bf16 %v88_v26, %v88_v26  ;;  %v650_v29 = vld [vmem:[#allocation7 + $0x38] sm:$0xff]   ;;  %v523_v30 = vld [vmem:[%s926_s2] ss:$0 sm:$0xff]  ;;  %v655_v42 = vld [vmem:[#allocation8 + $0x20] sm:$0xff]  }
  0x55   :  { %228 = vmatpush1.bf16.msra.mxu0 %v630_v5  ;;  %v653_v40 = vld [vmem:[#allocation8 + $0x10] sm:$0xff]   ;;  %v654_v41 = vld [vmem:[#allocation8 + $0x18] sm:$0xff]   ;;  %v656_v43 = vld [vmem:[#allocation8 + $0x28] sm:$0xff]  }
  0x56   :  { %229 = vmatprep.subr.bf16.mxu0 %v763_v1  ;;  %v657_v44 = vld [vmem:[#allocation8 + $0x30] sm:$0xff]   ;;  %v658_v45 = vld [vmem:[#allocation8 + $0x38] sm:$0xff]  }
  0x57   :  { %584 = vmatpush3.bf16.msra.mxu1 %v645_v14  ;;  %v540_v46 = vld [vmem:[%s928_s4] ss:$0 sm:$0xff] }
  0x58   :  { %585 = vmatprep.subr.bf16.mxu1 %v764_v2  ;;  %v549_v54 = vld [vmem:[%s930_s6] ss:$0 sm:$0xff] }
  0x59   :  { %230 = vmatpush1.bf16.msra.mxu0 %v631_v6  ;;  %v558_v59 = vld [vmem:[%s931_s7] ss:$0 sm:$0xff] }
  0x5a   :  { %231 = vmatprep.subr.bf16.mxu0 %v763_v1  ;;  %v559_v63 = vld [vmem:[#allocation2] ss:$0 sm:$0xff] }
  0x5b   :  { %586 = vmatpush3.bf16.msra.mxu1 %v646_v16 }
  0x5c   :  { %587 = vmatprep.subr.bf16.mxu1 %v764_v2 }
  0x5d   :  { %232 = vmatpush1.bf16.msra.mxu0 %v632_v7 }
  0x5e   :  { %233 = vmatprep.subr.bf16.mxu0 %v763_v1 }
  0x5f   :  { %588 = vmatpush3.bf16.msra.mxu1 %v647_v18 }
  0x60   :  { %589 = vmatprep.subr.bf16.mxu1 %v764_v2 }
  0x61   :  { %234 = vmatpush1.bf16.msra.mxu0 %v633_v11 }
  0x62   :  { %235 = vmatprep.subr.bf16.mxu0 %v763_v1 }
  0x63   :  { %590 = vmatpush3.bf16.msra.mxu1 %v648_v20 }
  0x64   :  { %591 = vmatprep.subr.bf16.mxu1 %v764_v2 }
  0x65   :  { %236 = vmatpush1.bf16.msra.mxu0 %v634_v13 }
  0x66   :  { %237 = vmatprep.subr.bf16.mxu0 %v763_v1 }
  0x67   :  { %592 = vmatpush3.bf16.msra.mxu1 %v649_v28 }
  0x68   :  { %593 = vmatprep.subr.bf16.mxu1 %v764_v2 }
  0x69   :  { %238 = vmatpush1.bf16.msra.mxu0 %v635_v15 }
  0x6a   :  { %239 = vmatprep.subr.bf16.mxu0 %v763_v1 }
  0x6b   :  { %594 = vmatpush3.bf16.msra.mxu1 %v650_v29 }
  0x6c   :  { %599 = vmatprep.subr.bf16.mxu1 %v764_v2 }
  0x6d   :  { %240 = vmatpush1.bf16.msra.mxu0 %v636_v17 }
  0x6e   :  { %241 = vmatprep.subr.bf16.mxu0 %v763_v1 }
  0x71   :  { %242 = vmatpush1.bf16.msra.mxu0 %v637_v19 }
  0x72   :  { %243 = vmatprep.subr.bf16.mxu0 %v763_v1 }
  0x75   :  { %244 = vmatpush1.bf16.msra.mxu0 %v638_v21 }
  0x76   :  { %245 = vmatprep.subr.bf16.mxu0 %v763_v1 }
  0x79   :  { %246 = vmatpush1.bf16.msra.mxu0 %v639_v22 }
  0x7a   :  { %247 = vmatprep.subr.bf16.mxu0 %v763_v1 }
  0x7d   :  { %248 = vmatpush1.bf16.msra.mxu0 %v640_v23 }
  0x7e   :  { %249 = vmatprep.subr.bf16.mxu0 %v763_v1 }
  0x81   :  { %250 = vmatpush1.bf16.msra.mxu0 %v641_v24 }
  0x82   :  { %251 = vmatprep.subr.bf16.mxu0 %v763_v1 }
  0x85   :  { %252 = vmatpush1.bf16.msra.mxu0 %v642_v25 }
  0x88   :  { %256 = vmatmul.mubr.bf16.vlgmr.msra.gmra.mrb[0].mxu0 %v90_v27 }
 0x15b   :  { %v257_v31 = vpop.f32.mrb[0].mxu0 }
 0x15c   :  { %v258_v32 = vadd.f32 %v523_v30, %v257_v31  ;;  %v259_v33 = vpop.f32.mrb[1].mxu0 }
 0x15d   :  { %v260_v34 = vpop.f32.mrb[2].mxu0 }
 0x15e   :  { %v263_v35 = vmax.f32 %v258_v32, 0.0  ;;  %v261_v36 = vpop.f32.mrb[3].mxu0 }
 0x160   :  { %v264_v38 = vpack.c.bf16 %v263_v35, %v263_v35 }
 0x162   :  { %596 = vmatmul.mubr.bf16.vlgmr.msra.gmra.mrb[0].mxu1 %v264_v38 }
 0x163   :  { %600 = vmatpush3.bf16.msra.mxu1 %v651_v37  ;;  %615 = vmatprep.mubr.msk.bf16.mxu1 %vm765_vm1, %v764_v2 }
 0x164   :  { %601 = vmatprep.subr.bf16.mxu1 %v764_v2 }
 0x167   :  { %602 = vmatpush3.bf16.msra.mxu1 %v652_v39 }
 0x168   :  { %603 = vmatprep.subr.bf16.mxu1 %v764_v2 }
 0x16b   :  { %604 = vmatpush3.bf16.msra.mxu1 %v653_v40 }
 0x16c   :  { %605 = vmatprep.subr.bf16.mxu1 %v764_v2 }
 0x16f   :  { %606 = vmatpush3.bf16.msra.mxu1 %v654_v41 }
 0x170   :  { %607 = vmatprep.subr.bf16.mxu1 %v764_v2 }
 0x173   :  { %608 = vmatpush3.bf16.msra.mxu1 %v655_v42 }
 0x174   :  { %609 = vmatprep.subr.bf16.mxu1 %v764_v2 }
 0x177   :  { %610 = vmatpush3.bf16.msra.mxu1 %v656_v43 }
 0x178   :  { %611 = vmatprep.subr.bf16.mxu1 %v764_v2 }
 0x17b   :  { %612 = vmatpush3.bf16.msra.mxu1 %v657_v44 }
 0x17c   :  { %613 = vmatprep.subr.bf16.mxu1 %v764_v2 }
 0x17f   :  { %614 = vmatpush3.bf16.msra.mxu1 %v658_v45 }
 0x235   :  { %v370_v47 = vpop.f32.mrb[0].mxu1 }
 0x236   :  { %v371_v48 = vadd.f32 %v540_v46, %v370_v47  ;;  %v597_v49 = vpop.f32.mrb[1].mxu1 }
 0x237   :  { %v373_v50 = vpop.f32.mrb[2].mxu1 }
 0x238   :  { %v376_v51 = vmax.f32 %v371_v48, 0.0  ;;  %v598_v52 = vpop.f32.mrb[3].mxu1 }
 0x23a   :  { %v377_v53 = vpack.c.bf16 %v376_v51, %v376_v51 }
 0x23c   :  { %616 = vmatmul.mubr.bf16.vlgmr.msra.gmra.mrb[4].mxu1 %v377_v53 }
 0x30f   :  { %v483_v55 = vpop.f32.mrb[4].mxu1 }
 0x310   :  { %v484_v56 = vadd.f32 %v549_v54, %v483_v55  ;;  %v617_v57 = vpop.f32.mrb[5].mxu1 }
 0x311   :  { %v486_v58 = vpop.f32.mrb[6].mxu1 }
 0x312   :  { %v489_v60 = vmax.f32 %v484_v56, 0.0  ;;  %v618_v61 = vpop.f32.mrb[7].mxu1 }
 0x314   :  { %v497_v62 = vmul.f32 %v558_v59, %v489_v60 }
 0x316   :  { %498 = vadd.xlane.f32.xlu0 %v497_v62 }
 0x3a3   :  { %v499_v0 = vpop.xlane.xlu0 %498 }
 0x3a4   :  { %v507_v1 = vadd.f32 %v559_v63, %v499_v0 }
 0x3a6   :  { %v560_v2 = vmul.f32 -1.442695, %v507_v1 }
 0x3a8   :  { %659 = vpow2.f32 %v560_v2 }
 0x3b2   :  { %v660_v3 = vpop.eup %659 }
 0x3b3   :  { %v511_v4 = vadd.f32 1.0, %v660_v3 }
 0x3b5   :  { %661 = vrcp.f32 %v511_v4 }
 0x3bf   :  { %v662_v5 = vpop.eup %661 }
 0x3c0   :  { %515 = vst.msk [vmem:[%s933_s9] sm:$0xff] %vm514_vm2, %v662_v5 }
 0x3c1   :  { %520 = vsyncpa [#allocation4], 1 }
 0x3c2   :  { %521 = vsyncpa [#allocation6], 1 }
 0x3c3   :  { %522 = vsyncpa [#allocation9], 1 }

</bundles_post_ra>
